<compile_context>
chip_gen: v7x
topology: tpu7x:2x2x1
jax: 0.10.0
libtpu: 0.0.40
codegen_flags: <defaults>
</compile_context>

<pallas_src>
import functools

import jax
import jax.numpy as jnp
from jax import lax
from jax.experimental import pallas as pl
from jax.experimental.pallas import tpu as pltpu


def _ce_loss_kernel(*refs, tn, n_rows, mask_rows, has_weight):
    if has_weight:
        logits_ref, targets_ref, weight_ref, out_ref = refs
    else:
        logits_ref, targets_ref, out_ref = refs
        weight_ref = None

    x = logits_ref[...].astype(jnp.float32)       # (tn, C) logits
    t = targets_ref[...].astype(jnp.float32)      # (tn, C) class probabilities

    # numerically-stable logsumexp along the class (lane) axis; the (tn, C)
    # log-probability temporary is never materialized.
    m = jnp.max(x, axis=-1, keepdims=True)                              # (tn, 1)
    shifted = x - m                                                     # (tn, C)
    lse = jnp.log(jnp.sum(jnp.exp(shifted), axis=-1, keepdims=True))    # (tn, 1)

    # folded weighted cross entropy: lse * sum_c(w*t) - sum_c(w*t*shifted)
    if has_weight:
        wt = weight_ref[...].astype(jnp.float32) * t                    # (tn, C)
    else:
        wt = t                                                          # no extra mul
    row_wt = jnp.sum(wt, axis=-1, keepdims=True)                        # (tn, 1)
    wts = jnp.sum(wt * shifted, axis=-1, keepdims=True)                 # (tn, 1)
    per_sample = lse * row_wt - wts                                     # (tn, 1)

    if mask_rows:
        # Last row tile overruns the array; overhang reads are undefined, so
        # zero those rows' contributions (one compare+select on a column).
        i = pl.program_id(0)
        rows = lax.broadcasted_iota(jnp.int32, per_sample.shape, 0) + i * tn
        per_sample = jnp.where(rows < n_rows, per_sample, 0.0)

    partial = jnp.sum(per_sample)                                       # f32 scalar
    # lane-dense, unmasked full-block store of the per-tile partial
    out_ref[...] = jnp.broadcast_to(partial, out_ref.shape).astype(jnp.float32)


def _vmem_capacity_bytes():
    try:
        return int(pltpu.get_tpu_info().vmem_capacity_bytes)
    except Exception:
        return 64 << 20   # assume the tightest generation (v7x per-TC)


def ce_loss(logits, targets, weight=None):
    """Cross-entropy loss with probability targets (reduction='mean').

    logits:  (N, C) float array (f32 or bf16 — streamed in HBM dtype, cast to
             f32 inside the kernel; pass bf16 directly to halve HBM traffic)
    targets: (N, C) float array of class probabilities (same contract)
    weight:  optional (C,) per-class weight
    """
    n, c = logits.shape
    assert targets.shape == (n, c)
    has_weight = weight is not None

    its_l = jnp.dtype(logits.dtype).itemsize
    its_t = jnp.dtype(targets.dtype).itemsize

    # ---- generation-aware row-tile sizing (memory-bound kernel) ----
    vmem_cap = _vmem_capacity_bytes()
    # ~8 MiB / input / pipeline buffer on 128-MiB-VMEM parts (v5e/v6e),
    # ~4 MiB on 64-MiB parts (v7x): 2 inputs x 2 buffers => 16-32 MiB total.
    budget_per_buffer = (8 << 20) if vmem_cap >= (100 << 20) else (4 << 20)
    c_vmem = ((c + 127) // 128) * 128            # VMEM lanes pad to 128
    row_vmem_bytes = c_vmem * max(its_l, its_t)
    tn = max(8, (budget_per_buffer // row_vmem_bytes) // 8 * 8)
    tn = min(tn, max(8, ((n + 7) // 8) * 8))     # don't exceed the problem
    n_tiles = pl.cdiv(n, tn)
    mask_rows = (n_tiles * tn) != n

    # ---- explicit scoped-VMEM limit (double-buffered inputs + outputs) ----
    vmem_needed = 2 * tn * c_vmem * (its_l + its_t)          # 2-deep pipeline
    if has_weight:
        vmem_needed += 2 * c_vmem * 4
    vmem_needed += 2 * 8 * 128 * 4
    vmem_limit = int(min(max(vmem_needed + (8 << 20), 32 << 20),
                         (vmem_cap // 4) * 3))
    # TODO(synk): if vmem_needed still exceeds this cap (extreme C), fall back
    # to a class-tiled (flash-style) variant instead of a single full row.

    # ---- cost hint: memory-bound reduction ----
    bytes_accessed = (n * c * (its_l + its_t)
                      + (c * 4 if has_weight else 0)
                      + n_tiles * 8 * 128 * 4)
    cost = pl.CostEstimate(
        flops=int((6 if has_weight else 5) * n * c),
        transcendentals=int(n * (c + 1)),
        bytes_accessed=int(bytes_accessed),
    )

    kernel = functools.partial(_ce_loss_kernel, tn=tn, n_rows=n,
                               mask_rows=mask_rows, has_weight=has_weight)

    in_specs = [
        pl.BlockSpec((tn, c), lambda i: (i, 0)),   # logits tile (full class row)
        pl.BlockSpec((tn, c), lambda i: (i, 0)),   # targets tile
    ]
    args = [logits, targets]
    if has_weight:
        w = jnp.asarray(weight, dtype=jnp.float32).reshape(1, c)
        in_specs.append(pl.BlockSpec((1, c), lambda i: (0, 0)))
        args.append(w)

    partials = pl.pallas_call(
        kernel,
        out_shape=jax.ShapeDtypeStruct((n_tiles, 8, 128), jnp.float32),
        grid=(n_tiles,),
        in_specs=in_specs,
        out_specs=pl.BlockSpec((1, 8, 128), lambda i: (i, 0, 0)),
        compiler_params=pltpu.CompilerParams(
            dimension_semantics=("parallel",),
            vmem_limit_bytes=vmem_limit,
        ),
        cost_estimate=cost,
    )(*args)

    # tiny final reduction in f32
    return jnp.sum(partials[:, 0, 0]) / jnp.float32(n)


def _ce_loss_ref(logits, targets, weight=None):
    # pure-JAX reference (mirrors torch.nn.CrossEntropyLoss with prob targets)
    x = logits.astype(jnp.float32)
    t = targets.astype(jnp.float32)
    logp = jax.nn.log_softmax(x, axis=-1)
    w = (jnp.ones((x.shape[-1],), jnp.float32) if weight is None
         else jnp.asarray(weight, jnp.float32))
    per_sample = -jnp.sum(w[None, :] * t * logp, axis=-1)
    return jnp.mean(per_sample)


if __name__ == "__main__":
    key = jax.random.PRNGKey(0)
    k1, k2, k3, k4 = jax.random.split(key, 4)

    # primary small shape: batch=8, classes=32
    N, C = 8, 32
    logits = jax.random.normal(k1, (N, C), dtype=jnp.float32)
    label_idx = jax.random.randint(k2, (N,), 0, C)
    targets = jax.nn.one_hot(label_idx, C, dtype=jnp.float32)

    # default CE_Loss() (weight=None)
    loss = jax.block_until_ready(ce_loss(logits, targets))
    ref = _ce_loss_ref(logits, targets)
    assert jnp.allclose(loss, ref, rtol=1e-5, atol=1e-5), (loss, ref)

    # weighted variant (CE_Loss(weight=[...]))
    weight = jnp.linspace(0.5, 2.0, C, dtype=jnp.float32)
    loss_w = jax.block_until_ready(ce_loss(logits, targets, weight))
    ref_w = _ce_loss_ref(logits, targets, weight)
    assert jnp.allclose(loss_w, ref_w, rtol=1e-5, atol=1e-5), (loss_w, ref_w)

    # ragged shapes + bf16 inputs: exercises in-kernel row masking and the
    # non-128-aligned class axis (no HBM padding copies anywhere).
    N2, C2 = 13, 40
    logits2 = jax.random.normal(k3, (N2, C2), dtype=jnp.bfloat16)
    targets2 = jax.nn.one_hot(jax.random.randint(k4, (N2,), 0, C2), C2,
                              dtype=jnp.bfloat16)
    loss2 = jax.block_until_ready(ce_loss(logits2, targets2))
    ref2 = _ce_loss_ref(logits2, targets2)
    assert jnp.allclose(loss2, ref2, rtol=1e-4, atol=1e-4), (loss2, ref2)

    print("KERNEL_OK")
</pallas_src>

<mosaic_0001>
module attributes {stable_mosaic.version = 11 : i64} {
  func.func @_ce_loss_kernel(%arg0: i32, %arg1: memref<8x32xf32, #tpu.memory_space<vmem>>, %arg2: memref<8x32xf32, #tpu.memory_space<vmem>>, %arg3: memref<1x8x128xf32, #tpu.memory_space<vmem>>) attributes {dimension_semantics = [#tpu.dimension_semantics<parallel>], iteration_bounds = array<i64: 1>, scalar_prefetch = 0 : i64, scratch_operands = 0 : i64, tpu.core_type = #tpu.core_type<tc>, window_params = [{transform_indices = @transform_0, window_bounds = array<i64: 8, 32>}, {transform_indices = @transform_1, window_bounds = array<i64: 8, 32>}, {transform_indices = @transform_2, window_bounds = array<i64: 1, 8, 128>}]} {
    %c0 = arith.constant 0 : index
    %c0_0 = arith.constant 0 : index
    %0 = vector.load %arg1[%c0, %c0_0] : memref<8x32xf32, #tpu.memory_space<vmem>>, vector<8x32xf32>
    %c0_1 = arith.constant 0 : index
    %c0_2 = arith.constant 0 : index
    %1 = vector.load %arg2[%c0_1, %c0_2] : memref<8x32xf32, #tpu.memory_space<vmem>>, vector<8x32xf32>
    %cst = arith.constant dense<0xFF800000> : vector<8xf32>
    %2 = vector.multi_reduction <maximumf>, %0, %cst [1] : vector<8x32xf32> to vector<8xf32>
    %3 = vector.shape_cast %2 : vector<8xf32> to vector<8x1xf32>
    %4 = vector.broadcast %3 : vector<8x1xf32> to vector<8x32xf32>
    %5 = arith.subf %0, %4 : vector<8x32xf32>
    %6 = math.exp %5 : vector<8x32xf32>
    %cst_3 = arith.constant dense<0.000000e+00> : vector<8xf32>
    %7 = vector.multi_reduction <add>, %6, %cst_3 [1] : vector<8x32xf32> to vector<8xf32>
    %8 = vector.shape_cast %7 : vector<8xf32> to vector<8x1xf32>
    %9 = math.log %8 : vector<8x1xf32>
    %cst_4 = arith.constant dense<0.000000e+00> : vector<8xf32>
    %10 = vector.multi_reduction <add>, %1, %cst_4 [1] : vector<8x32xf32> to vector<8xf32>
    %11 = vector.shape_cast %10 : vector<8xf32> to vector<8x1xf32>
    %12 = arith.mulf %1, %5 : vector<8x32xf32>
    %cst_5 = arith.constant dense<0.000000e+00> : vector<8xf32>
    %13 = vector.multi_reduction <add>, %12, %cst_5 [1] : vector<8x32xf32> to vector<8xf32>
    %14 = vector.shape_cast %13 : vector<8xf32> to vector<8x1xf32>
    %15 = arith.mulf %9, %11 : vector<8x1xf32>
    %16 = arith.subf %15, %14 : vector<8x1xf32>
    %17 = vector.shape_cast %16 : vector<8x1xf32> to vector<1x8x1xf32>
    %cst_6 = arith.constant dense<0.000000e+00> : vector<1xf32>
    %18 = vector.multi_reduction <add>, %17, %cst_6 [1, 2] : vector<1x8x1xf32> to vector<1xf32>
    %19 = vector.shape_cast %18 : vector<1xf32> to vector<1x1x1xf32>
    %20 = vector.extract %19[0, 0, 0] : f32 from vector<1x1x1xf32>
    %21 = vector.broadcast %20 : f32 to vector<1x8x128xf32>
    %c0_7 = arith.constant 0 : index
    %c0_8 = arith.constant 0 : index
    %c0_9 = arith.constant 0 : index
    %22 = vector.load %arg3[%c0_7, %c0_8, %c0_9] : memref<1x8x128xf32, #tpu.memory_space<vmem>>, vector<1x8x128xf32>
    tpu.vector_store %arg3[%c0_7, %c0_8, %c0_9], %21 {strides = array<i32>} : memref<1x8x128xf32, #tpu.memory_space<vmem>>, vector<1x8x128xf32>,
    return
  }
  func.func @transform_0(%arg0: i32) -> (i32, i32) {
    %c0_i32 = arith.constant 0 : i32
    %c0_i32_0 = arith.constant 0 : i32
    return %arg0, %c0_i32 : i32, i32
  }
  func.func @transform_1(%arg0: i32) -> (i32, i32) {
    %c0_i32 = arith.constant 0 : i32
    %c0_i32_0 = arith.constant 0 : i32
    return %arg0, %c0_i32 : i32, i32
  }
  func.func @transform_2(%arg0: i32) -> (i32, i32, i32) {
    %c0_i32 = arith.constant 0 : i32
    %c0_i32_0 = arith.constant 0 : i32
    %c0_i32_1 = arith.constant 0 : i32
    return %arg0, %c0_i32, %c0_i32_0 : i32, i32, i32
  }
}

</mosaic_0001>

<bundles_post_ra>
// kernel: tpu_custom_call.1
= control target key start
LH: loop header
LB: loop body
LE: loop exit
PB: predicated region body
PF: predicated region fallthrough
CT: control target
= control target key end

     0   :  { %7 = vsyncpa [#allocation3], 0  ;;  %s223_s0 = inlined_call_operand.hbm [shape: f32[8,32], index: 0, kind: input, shape index: {}]   ;;  %s224_s1 = inlined_call_operand.hbm [shape: f32[8,32], index: 1, kind: input, shape index: {}]   ;;  %s225_s2 = inlined_call_operand.hbm [shape: f32[1,8,128], index: 2, kind: output, shape index: {}]  }
   0x1   :  { %8 = vsyncpa [#allocation6], 0 }
   0x2   :  { %9 = vsyncpa [#allocation4], 0  ;;  %s169_s9 = smov [#allocation2]   ;;  %s170_s11 = smov [#allocation5]  }
   0x3   :  { %s16_s10 = sshll.u32 %s169_s9, 4  ;;  %s26_s12 = sshll.u32 %s170_s11, 4  ;;  %s17_s10 = int_to_ptr.vmem [resolvable:$true] %s16_s10  ;;  %s27_s12 = int_to_ptr.vmem [resolvable:$true] %s26_s12 }
   0x4   :  { %s97_s15 = scalar_lea.hbm %s223_s0, 128 }
   0x5   :  { %p98_p0 = scmp.ne.s32.totalorder %s223_s0, %s97_s15  ;;  %p101_p1 = scmp.lt.u32.totalorder %s97_s15, %s223_s0 }
   0x7   :  { %p103_p2 = pnand %p101_p1, %p98_p0 }
   0x9   :  { %106 = shalt.err (!%p103_p2)
}
   0xa   :  { %s107_s20 = scalar_lea.vmem %s17_s10, 128  ;;  %p112_p4 = scmp.lt.s32.totalorder %s17_s10, %s17_s10 }
   0xb   :  { %p108_p3 = scmp.ne.s32.totalorder %s17_s10, %s107_s20  ;;  %p113_p5 = scmp.lt.s32.totalorder %s107_s20, %s107_s20 }
   0xd   :  { %p114_p6 = por %p113_p5, %p112_p4 }
   0xf   :  { %p115_p7 = pnand %p114_p6, %p108_p3 }
  0x11   :  { %118 = shalt.err (!%p115_p7)
}
  0x12   :  { %19 = dma.hbm_to_vmem [thread:$0]  %s223_s0, 128, %s17_s10, [#allocation3]  }
  0x13   :  { %s119_s25 = scalar_lea.hbm %s224_s1, 128 }
  0x14   :  { %p120_p8 = scmp.ne.s32.totalorder %s224_s1, %s119_s25  ;;  %p123_p9 = scmp.lt.u32.totalorder %s119_s25, %s224_s1 }
  0x16   :  { %p125_p10 = pnand %p123_p9, %p120_p8 }
  0x18   :  { %128 = shalt.err (!%p125_p10)
}
  0x19   :  { %s129_s30 = scalar_lea.vmem %s27_s12, 128  ;;  %p134_p12 = scmp.lt.s32.totalorder %s27_s12, %s27_s12 }
  0x1a   :  { %p130_p11 = scmp.ne.s32.totalorder %s27_s12, %s129_s30  ;;  %p135_p13 = scmp.lt.s32.totalorder %s129_s30, %s129_s30 }
  0x1c   :  { %p136_p0 = por %p135_p13, %p134_p12 }
  0x1e   :  { %p137_p1 = pnand %p136_p0, %p130_p11 }
  0x20   :  { %140 = shalt.err (!%p137_p1)
}
  0x21   :  { %29 = dma.hbm_to_vmem [thread:$0]  %s224_s1, 128, %s27_s12, [#allocation6]  }
  0x22   :  { %163 = dma.done.wait [#allocation3], 128  }
  0x23   :  { %164 = vsyncadd [#allocation3], 4294967168 }
  0x24   :  { %165 = dma.done.wait [#allocation6], 128  }
  0x25   :  { %166 = vsyncadd [#allocation6], 4294967168  ;;  %vm38_vm0 = vcmask 261120   ;;  %v36_v0 = vld [vmem:[#allocation2] sm:$0xff]  ;;  %v37_v2 = vld [vmem:[#allocation5] sm:$0xff]  ;;  %vm59_vm1 = vcmask 7168  }
  0x26   :  { %v39_v1 = vsel %vm38_vm0, %v36_v0, -inf  ;;  %v50_v3 = vsel %vm38_vm0, %v37_v2, 0.0  ;;  %s171_s1 = smov [#allocation7]  }
  0x27   :  { %40 = vmax.xlane.f32.xlu0 %v39_v1  ;;  %51 = vadd.xlane.f32.xlu1 %v50_v3  ;;  %s78_s4 = sshll.u32 %s171_s1, 4  ;;  %s79_s4 = int_to_ptr.vmem [resolvable:$true] %s78_s4 }
  0x28   :  { %s141_s6 = scalar_lea.vmem %s79_s4, 128  ;;  %p146_p3 = scmp.lt.s32.totalorder %s79_s4, %s79_s4 }
  0x29   :  { %p142_p2 = scmp.ne.s32.totalorder %s79_s4, %s141_s6  ;;  %p147_p4 = scmp.lt.s32.totalorder %s141_s6, %s141_s6 }
  0x2b   :  { %p148_p5 = por %p147_p4, %p146_p3 }
  0x2d   :  { %p149_p6 = pnand %p148_p5, %p142_p2 }
  0xb4   :  { %v41_v4 = vpop.xlane.xlu0 %40  ;;  %v52_v12 = vpop.xlane.xlu1 %51 }
  0xb5   :  { %v42_v5 = vsub.f32 %v36_v0, %v41_v4 }
  0xb7   :  { %v43_v6 = vmul.f32 1.442695, %v42_v5  ;;  %v53_v7 = vmul.f32 %v42_v5, %v37_v2 }
  0xb9   :  { %93 = vpow2.f32 %v43_v6  ;;  %v54_v8 = vsel %vm38_vm0, %v53_v7, 0.0 }
  0xba   :  { %55 = vadd.xlane.f32.xlu1 %v54_v8 }
  0xc3   :  { %v94_v9 = vpop.eup %93 }
  0xc4   :  { %v45_v10 = vsel %vm38_vm0, %v94_v9, 0.0 }
  0xc5   :  { %46 = vadd.xlane.f32.xlu0 %v45_v10 }
 0x147   :  { %v56_v16 = vpop.xlane.xlu1 %55 }
 0x152   :  { %v47_v11 = vpop.xlane.xlu0 %46 }
 0x153   :  { %95 = vlog2.f32 %v47_v11 }
 0x15d   :  { %v96_v13 = vpop.eup %95 }
 0x15e   :  { %v49_v14 = vmul.f32 0.6931472, %v96_v13 }
 0x160   :  { %v57_v15 = vmul.f32 %v52_v12, %v49_v14 }
 0x162   :  { %v58_v17 = vsub.f32 %v57_v15, %v56_v16 }
 0x164   :  { %v60_v18 = vsel %vm59_vm1, %v58_v17, 0.0 }
 0x165   :  { %61 = vadd.xlane.f32.xlu0 %v60_v18 }
 0x1f2   :  { %v62_v19 = vpop.xlane.xlu0 %61 }
 0x1f3   :  { %v63_v20 = vrot.slane %v62_v19, 4 }
 0x1f5   :  { %v64_v21 = vadd.f32 %v63_v20, %v62_v19 }
 0x1f7   :  { %v65_v22 = vrot.slane %v64_v21, 2 }
 0x1f9   :  { %v66_v23 = vadd.f32 %v65_v22, %v64_v21 }
 0x1fb   :  { %v67_v24 = vrot.slane %v66_v23, 1 }
 0x1fd   :  { %v68_v25 = vadd.f32 %v67_v24, %v66_v23 }
 0x1ff   :  { %88 = vpush %v68_v25 }
 0x230   :  { %s89_s5 = spop %88 }
 0x231   :  { %v70_v26 = vstv %s89_s5 }
 0x232   :  { %71 = vst [vmem:[#allocation7] sm:$0xff] %v70_v26 }
 0x233   :  { %152 = shalt.err (!%p149_p6)
}
 0x234   :  { %s153_s9 = scalar_lea.hbm %s225_s2, 128 }
 0x235   :  { %p154_p7 = scmp.ne.s32.totalorder %s225_s2, %s153_s9  ;;  %p157_p8 = scmp.lt.u32.totalorder %s153_s9, %s225_s2 }
 0x237   :  { %p159_p9 = pnand %p157_p8, %p154_p7 }
 0x239   :  { %162 = shalt.err (!%p159_p9)
}
 0x23a   :  { %81 = dma.vmem_to_hbm [thread:$0]  %s79_s4, 128, %s225_s2, [#allocation4]  }
 0x23b   :  { %167 = dma.done.wait [#allocation4], 128  }
 0x23c   :  { %168 = vsyncadd [#allocation4], 4294967168 }
 0x23d   :  { %85 = vsyncpa [#allocation3], 1 }
 0x23e   :  { %86 = vsyncpa [#allocation6], 1 }
 0x23f   :  { %87 = vsyncpa [#allocation4], 1 }

</bundles_post_ra>
